<compile_context>
chip_gen: v7x
topology: tpu7x:2x2x1
jax: 0.10.0
libtpu: 0.0.40
codegen_flags: <defaults>
</compile_context>

<pallas_src>
import functools

import jax
import jax.numpy as jnp
from jax.experimental import pallas as pl
from jax.experimental.pallas import tpu as pltpu

_LANE = 128      # lane width / lane-dense output padding
_SUBLANE = 8


def _round_up(x, m):
    return (x + m - 1) // m * m


def fnn_kernel(ids_ref, wf_ref, b1_ref, g_ref, beta_ref, w2_ref, b2_ref,
               out_ref):
    """Fused: multi-hot gather+fc1 (one batched bf16 matmul) -> LN -> ReLU -> fc2."""
    ids_t = ids_ref[...]                                  # (S, TB) int32
    seq, tb = ids_t.shape
    _, vp, _hid = wf_ref.shape

    # 0/1 one-hot of every (position, row) against the 128-padded vocab axis.
    lane = jax.lax.broadcasted_iota(jnp.int32, (seq, tb, vp), 2)
    onehot = (lane == ids_t[:, :, None]).astype(jnp.bfloat16)   # exact in bf16

    # Embedding gather + fc1 fused: wf[s, v, :] = emb[v, :] @ w1[s*E:(s+1)*E, :]
    # One batched bf16 MXU contraction (K padded to 128), f32 accumulation.
    partial = jnp.einsum("stv,svh->sth", onehot, wf_ref[...],
                         preferred_element_type=jnp.float32)    # (S, TB, H)
    hidden = jnp.sum(partial, axis=0) + b1_ref[...]             # (TB, H) f32

    # LayerNorm over the TRUE hidden width H (two-pass variance, f32, eps=1e-5).
    mean = jnp.mean(hidden, axis=-1, keepdims=True)
    cent = hidden - mean
    var = jnp.mean(cent * cent, axis=-1, keepdims=True)
    hidden = cent * jax.lax.rsqrt(var + 1e-5)                   # rsqrt -> EUP
    hidden = hidden * g_ref[...] + beta_ref[...]

    # ReLU
    hidden = jnp.maximum(hidden, 0.0)

    # Dropout(0.3): inference-mode identity.
    # TODO(synk): training-mode dropout (pltpu.prng_random_bits mask) not emitted.

    # fc2 against lane-dense zero-padded bf16 weights -> unmasked (TB, 128) store.
    out = jnp.dot(hidden.astype(jnp.bfloat16), w2_ref[...],
                  preferred_element_type=jnp.float32)
    out_ref[...] = out + b2_ref[...]


@functools.partial(jax.jit, static_argnames=("block_b",))
def hate_speech_detector_fnn(text_ids, params, block_b=512):
    """text_ids: (B, S) int32 token ids.  Returns (B, output_dim) logits."""
    emb = params["embedding"]
    w1, b1 = params["w1"], params["b1"]
    gamma, beta = params["gamma"], params["beta"]
    w2, b2 = params["w2"], params["b2"]

    batch, seq_len = text_ids.shape
    vocab, edim = emb.shape
    hid = w1.shape[1]
    out_dim = w2.shape[1]
    vp = _round_up(vocab, _LANE)            # pad contraction axis to 128 lanes

    # Gate the toy-vocab multi-hot strategy before it silently blows VMEM.
    fused_table_bytes = seq_len * vp * hid * 2
    if fused_table_bytes > (8 << 20) or vp > 2048:
        raise NotImplementedError(
            "multi-hot fused gather+fc1 is for small vocabularies only; "
            "use a scalar-prefetch / DMA row-gather of embedding rows instead.")

    # Fused gather+fc1 table: wf[s, v, :] = emb[v, :] @ w1[s*E:(s+1)*E, :].
    # (Tiny precompute; in production this table would be prepared once.)
    wf = jnp.einsum("ve,seh->svh", emb, w1.reshape(seq_len, edim, hid))
    wf = jnp.pad(wf, ((0, 0), (0, vp - vocab), (0, 0))).astype(jnp.bfloat16)

    # Lane-dense fc2: zero-pad the narrow output to a full 128-lane store.
    out_pad = _round_up(out_dim, _LANE)
    w2_p = jnp.pad(w2, ((0, 0), (0, out_pad - out_dim))).astype(jnp.bfloat16)
    b2_p = jnp.pad(b2, ((0, 0), (0, out_pad - out_dim)))

    # Batch blocking: one big block for small batches (amortizes per-step
    # overhead on single-TC v5e/v6e); >= 2 steps once there is enough work so
    # the "parallel" axis can shard across the two v7x TensorCores.  Multi-step
    # blocks are 128-aligned (ids block's lane dim).
    b_aligned = _round_up(batch, _SUBLANE)
    if b_aligned <= block_b and batch <= 256:
        tb = b_aligned
    else:
        n = max(2, pl.cdiv(batch, block_b))
        tb = _round_up(pl.cdiv(batch, n), _LANE)
    n_steps = pl.cdiv(batch, tb)
    b_pad = n_steps * tb

    # ids transposed to (S, B) so the kernel's one-hot batch dims line up with
    # the (S, Vp, H) fused table without any in-kernel transpose of the table.
    ids_t = jnp.pad(text_ids.astype(jnp.int32),
                    ((0, b_pad - batch), (0, 0))).T           # (S, b_pad)

    def full(a):
        return pl.BlockSpec(a.shape, lambda i, _nd=a.ndim: (0,) * _nd)

    out_padded = pl.pallas_call(
        fnn_kernel,
        out_shape=jax.ShapeDtypeStruct((b_pad, out_pad), jnp.float32),
        grid=(n_steps,),
        in_specs=[
            pl.BlockSpec((seq_len, tb), lambda i: (0, i)),    # token ids (S, TB)
            full(wf), full(b1), full(gamma), full(beta),
            full(w2_p), full(b2_p),
        ],
        out_specs=pl.BlockSpec((tb, out_pad), lambda i: (i, 0)),
        compiler_params=pltpu.CompilerParams(
            dimension_semantics=("parallel",),
            vmem_limit_bytes=32 * 1024 * 1024,
        ),
    )(ids_t, wf, b1, gamma, beta, w2_p, b2_p)

    # Strip batch padding and the zero-padded logit columns (not real classes).
    return out_padded[:batch, :out_dim]


def init_params(key, vocab_size, hid_dim, embed_dim, output_dim, pad_idx,
                max_seq_length):
    k_emb, k_w1, k_b1, k_w2, k_b2 = jax.random.split(key, 5)
    in_dim = embed_dim * max_seq_length

    embedding = jax.random.normal(k_emb, (vocab_size, embed_dim), jnp.float32)
    embedding = embedding.at[pad_idx].set(0.0)    # padding_idx => zero row

    # nn.Linear-style uniform init; stored as (in, out) so kernel does x @ W.
    lim1 = 1.0 / jnp.sqrt(in_dim)
    w1 = jax.random.uniform(k_w1, (in_dim, hid_dim), jnp.float32, -lim1, lim1)
    b1 = jax.random.uniform(k_b1, (1, hid_dim), jnp.float32, -lim1, lim1)

    lim2 = 1.0 / jnp.sqrt(hid_dim)
    w2 = jax.random.uniform(k_w2, (hid_dim, output_dim), jnp.float32, -lim2, lim2)
    b2 = jax.random.uniform(k_b2, (1, output_dim), jnp.float32, -lim2, lim2)

    gamma = jnp.ones((1, hid_dim), jnp.float32)   # LayerNorm weight
    beta = jnp.zeros((1, hid_dim), jnp.float32)   # LayerNorm bias

    return {"embedding": embedding, "w1": w1, "b1": b1,
            "gamma": gamma, "beta": beta, "w2": w2, "b2": b2}


def _reference(text_ids, params):
    """Pure-JAX reference of the PyTorch forward (eval mode)."""
    x = jnp.take(params["embedding"], text_ids, axis=0)
    x = x.reshape(text_ids.shape[0], -1)
    h = x @ params["w1"] + params["b1"]
    mu = jnp.mean(h, axis=-1, keepdims=True)
    var = jnp.mean((h - mu) ** 2, axis=-1, keepdims=True)
    h = (h - mu) * jax.lax.rsqrt(var + 1e-5)
    h = h * params["gamma"] + params["beta"]
    h = jnp.maximum(h, 0.0)
    return h @ params["w2"] + params["b2"]


if __name__ == "__main__":
    # Small shapes consistent with the module.
    vocab_size = 50
    embed_dim = 8
    max_seq_length = 16   # flattened fc1 input dim = 128
    hid_dim = 32
    output_dim = 2
    pad_idx = 0
    batch = 8

    key = jax.random.PRNGKey(0)
    k_params, k_text = jax.random.split(key)
    params = init_params(k_params, vocab_size, hid_dim, embed_dim,
                         output_dim, pad_idx, max_seq_length)

    text = jax.random.randint(k_text, (batch, max_seq_length), 0, vocab_size,
                              dtype=jnp.int32)

    out = hate_speech_detector_fnn(text, params)
    jax.block_until_ready(out)
    assert out.shape == (batch, output_dim)

    ref = _reference(text, params)
    assert jnp.allclose(out, ref, atol=2e-2, rtol=2e-2), "mismatch vs JAX reference"

    print("KERNEL_OK")
</pallas_src>

<mosaic_0001>
module attributes {stable_mosaic.version = 11 : i64} {
  func.func @fnn_kernel(%arg0: i32, %arg1: memref<16x8xi32, #tpu.memory_space<vmem>>, %arg2: memref<16x128x32xbf16, #tpu.memory_space<vmem>>, %arg3: memref<1x32xf32, #tpu.memory_space<vmem>>, %arg4: memref<1x32xf32, #tpu.memory_space<vmem>>, %arg5: memref<1x32xf32, #tpu.memory_space<vmem>>, %arg6: memref<32x128xbf16, #tpu.memory_space<vmem>>, %arg7: memref<1x128xf32, #tpu.memory_space<vmem>>, %arg8: memref<8x128xf32, #tpu.memory_space<vmem>>) attributes {dimension_semantics = [#tpu.dimension_semantics<parallel>], iteration_bounds = array<i64: 1>, scalar_prefetch = 0 : i64, scratch_operands = 0 : i64, tpu.core_type = #tpu.core_type<tc>, window_params = [{transform_indices = @transform_0, window_bounds = array<i64: 16, 8>}, {pipeline_mode = #tpu.pipeline_mode<synchronous>, transform_indices = @transform_1, window_bounds = array<i64: 16, 128, 32>}, {pipeline_mode = #tpu.pipeline_mode<synchronous>, transform_indices = @transform_2, window_bounds = array<i64: 1, 32>}, {pipeline_mode = #tpu.pipeline_mode<synchronous>, transform_indices = @transform_3, window_bounds = array<i64: 1, 32>}, {pipeline_mode = #tpu.pipeline_mode<synchronous>, transform_indices = @transform_4, window_bounds = array<i64: 1, 32>}, {pipeline_mode = #tpu.pipeline_mode<synchronous>, transform_indices = @transform_5, window_bounds = array<i64: 32, 128>}, {pipeline_mode = #tpu.pipeline_mode<synchronous>, transform_indices = @transform_6, window_bounds = array<i64: 1, 128>}, {transform_indices = @transform_7, window_bounds = array<i64: 8, 128>}]} {
    %c0 = arith.constant 0 : index
    %c0_0 = arith.constant 0 : index
    %0 = vector.load %arg1[%c0, %c0_0] : memref<16x8xi32, #tpu.memory_space<vmem>>, vector<16x8xi32>
    %1 = tpu.iota {dimensions = array<i32: 2>} : vector<16x8x128xi32>
    %2 = vector.shape_cast %0 : vector<16x8xi32> to vector<16x8x1xi32>
    %3 = vector.broadcast %2 : vector<16x8x1xi32> to vector<16x8x128xi32>
    %4 = arith.cmpi eq, %1, %3 : vector<16x8x128xi32>
    %5 = arith.extui %4 : vector<16x8x128xi1> to vector<16x8x128xi32>
    %6 = arith.sitofp %5 : vector<16x8x128xi32> to vector<16x8x128xf32>
    %7 = arith.truncf %6 : vector<16x8x128xf32> to vector<16x8x128xbf16>
    %c0_1 = arith.constant 0 : index
    %c0_2 = arith.constant 0 : index
    %c0_3 = arith.constant 0 : index
    %8 = vector.load %arg2[%c0_1, %c0_2, %c0_3] : memref<16x128x32xbf16, #tpu.memory_space<vmem>>, vector<16x128x32xbf16>
    "tpu.trace_start"() <{level = 10 : i32, message = "stv,svh->sth"}> : () -> ()
    %cst = arith.constant dense<0.000000e+00> : vector<16x8x32xf32>
    %9 = tpu.matmul %7, %8, %cst {dimension_numbers = #tpu.dot_dimension_numbers<[2], [1], [1], [2], [0, 0, 0, 1, 1, 2], [0], [0]>} : vector<16x8x128xbf16>, vector<16x128x32xbf16>, vector<16x8x32xf32> -> vector<16x8x32xf32>
    "tpu.trace_stop"() : () -> ()
    %cst_4 = arith.constant dense<0.000000e+00> : vector<8x32xf32>
    %10 = vector.multi_reduction <add>, %9, %cst_4 [0] : vector<16x8x32xf32> to vector<8x32xf32>
    %c0_5 = arith.constant 0 : index
    %c0_6 = arith.constant 0 : index
    %11 = vector.load %arg3[%c0_5, %c0_6] : memref<1x32xf32, #tpu.memory_space<vmem>>, vector<1x32xf32>
    %12 = vector.broadcast %11 : vector<1x32xf32> to vector<8x32xf32>
    %13 = arith.addf %10, %12 : vector<8x32xf32>
    %cst_7 = arith.constant dense<0.000000e+00> : vector<8xf32>
    %14 = vector.multi_reduction <add>, %13, %cst_7 [1] : vector<8x32xf32> to vector<8xf32>
    %15 = vector.shape_cast %14 : vector<8xf32> to vector<8x1xf32>
    %cst_8 = arith.constant 3.200000e+01 : f32
    %16 = vector.broadcast %cst_8 : f32 to vector<8x1xf32>
    %17 = arith.divf %15, %16 : vector<8x1xf32>
    %18 = vector.broadcast %17 : vector<8x1xf32> to vector<8x32xf32>
    %19 = arith.subf %13, %18 : vector<8x32xf32>
    %20 = arith.mulf %19, %19 : vector<8x32xf32>
    %cst_9 = arith.constant dense<0.000000e+00> : vector<8xf32>
    %21 = vector.multi_reduction <add>, %20, %cst_9 [1] : vector<8x32xf32> to vector<8xf32>
    %22 = vector.shape_cast %21 : vector<8xf32> to vector<8x1xf32>
    %cst_10 = arith.constant 3.200000e+01 : f32
    %23 = vector.broadcast %cst_10 : f32 to vector<8x1xf32>
    %24 = arith.divf %22, %23 : vector<8x1xf32>
    %cst_11 = arith.constant 9.99999974E-6 : f32
    %25 = vector.broadcast %cst_11 : f32 to vector<8x1xf32>
    %26 = arith.addf %24, %25 : vector<8x1xf32>
    %27 = math.rsqrt %26 : vector<8x1xf32>
    %28 = vector.broadcast %27 : vector<8x1xf32> to vector<8x32xf32>
    %29 = arith.mulf %19, %28 : vector<8x32xf32>
    %c0_12 = arith.constant 0 : index
    %c0_13 = arith.constant 0 : index
    %30 = vector.load %arg4[%c0_12, %c0_13] : memref<1x32xf32, #tpu.memory_space<vmem>>, vector<1x32xf32>
    %31 = vector.broadcast %30 : vector<1x32xf32> to vector<8x32xf32>
    %32 = arith.mulf %29, %31 : vector<8x32xf32>
    %c0_14 = arith.constant 0 : index
    %c0_15 = arith.constant 0 : index
    %33 = vector.load %arg5[%c0_14, %c0_15] : memref<1x32xf32, #tpu.memory_space<vmem>>, vector<1x32xf32>
    %34 = vector.broadcast %33 : vector<1x32xf32> to vector<8x32xf32>
    %35 = arith.addf %32, %34 : vector<8x32xf32>
    %cst_16 = arith.constant 0.000000e+00 : f32
    %36 = vector.broadcast %cst_16 : f32 to vector<8x32xf32>
    %37 = arith.maximumf %35, %36 : vector<8x32xf32>
    %38 = arith.truncf %37 : vector<8x32xf32> to vector<8x32xbf16>
    %c0_17 = arith.constant 0 : index
    %c0_18 = arith.constant 0 : index
    %39 = vector.load %arg6[%c0_17, %c0_18] : memref<32x128xbf16, #tpu.memory_space<vmem>>, vector<32x128xbf16>
    %cst_19 = arith.constant dense<0.000000e+00> : vector<8x128xf32>
    %40 = tpu.matmul %38, %39, %cst_19 {dimension_numbers = #tpu.dot_dimension_numbers<[1], [0], [0], [1], [0, 0, 1, 1], [], []>} : vector<8x32xbf16>, vector<32x128xbf16>, vector<8x128xf32> -> vector<8x128xf32>
    %c0_20 = arith.constant 0 : index
    %c0_21 = arith.constant 0 : index
    %41 = vector.load %arg7[%c0_20, %c0_21] : memref<1x128xf32, #tpu.memory_space<vmem>>, vector<1x128xf32>
    %42 = vector.broadcast %41 : vector<1x128xf32> to vector<8x128xf32>
    %43 = arith.addf %40, %42 : vector<8x128xf32>
    %c0_22 = arith.constant 0 : index
    %c0_23 = arith.constant 0 : index
    %44 = vector.load %arg8[%c0_22, %c0_23] : memref<8x128xf32, #tpu.memory_space<vmem>>, vector<8x128xf32>
    tpu.vector_store %arg8[%c0_22, %c0_23], %43 {strides = array<i32>} : memref<8x128xf32, #tpu.memory_space<vmem>>, vector<8x128xf32>,
    return
  }
  func.func @transform_0(%arg0: i32) -> (i32, i32) {
    %c0_i32 = arith.constant 0 : i32
    %c0_i32_0 = arith.constant 0 : i32
    return %c0_i32, %arg0 : i32, i32
  }
  func.func @transform_1(%arg0: i32) -> (i32, i32, i32) {
    %c0_i32 = arith.constant 0 : i32
    %c0_i32_0 = arith.constant 0 : i32
    %c0_i32_1 = arith.constant 0 : i32
    %c0_i32_2 = arith.constant 0 : i32
    return %c0_i32, %c0_i32_0, %c0_i32_1 : i32, i32, i32
  }
  func.func @transform_2(%arg0: i32) -> (i32, i32) {
    %c0_i32 = arith.constant 0 : i32
    %c0_i32_0 = arith.constant 0 : i32
    %c0_i32_1 = arith.constant 0 : i32
    return %c0_i32, %c0_i32_0 : i32, i32
  }
  func.func @transform_3(%arg0: i32) -> (i32, i32) {
    %c0_i32 = arith.constant 0 : i32
    %c0_i32_0 = arith.constant 0 : i32
    %c0_i32_1 = arith.constant 0 : i32
    return %c0_i32, %c0_i32_0 : i32, i32
  }
  func.func @transform_4(%arg0: i32) -> (i32, i32) {
    %c0_i32 = arith.constant 0 : i32
    %c0_i32_0 = arith.constant 0 : i32
    %c0_i32_1 = arith.constant 0 : i32
    return %c0_i32, %c0_i32_0 : i32, i32
  }
  func.func @transform_5(%arg0: i32) -> (i32, i32) {
    %c0_i32 = arith.constant 0 : i32
    %c0_i32_0 = arith.constant 0 : i32
    %c0_i32_1 = arith.constant 0 : i32
    return %c0_i32, %c0_i32_0 : i32, i32
  }
  func.func @transform_6(%arg0: i32) -> (i32, i32) {
    %c0_i32 = arith.constant 0 : i32
    %c0_i32_0 = arith.constant 0 : i32
    %c0_i32_1 = arith.constant 0 : i32
    return %c0_i32, %c0_i32_0 : i32, i32
  }
  func.func @transform_7(%arg0: i32) -> (i32, i32) {
    %c0_i32 = arith.constant 0 : i32
    %c0_i32_0 = arith.constant 0 : i32
    return %arg0, %c0_i32 : i32, i32
  }
}

</mosaic_0001>

<bundles_post_ra>
// kernel: hate_speech_detector_fnn.1
= control target key start
LH: loop header
LB: loop body
LE: loop exit
PB: predicated region body
PF: predicated region fallthrough
CT: control target
= control target key end

     0   :  { %v29_v0 = vlaneseq  ;;  %v2807_v1 = vmov 0.0   ;;  %vm2808_vm0 = vmmov 0   ;;  %v2809_v48 = vmov 1.0|1.0   ;;  %s3506_s0 = inlined_call_operand.vmem [shape: s32[16,8], index: 0, kind: input, shape index: {}]   ;;  %s3507_s1 = inlined_call_operand.vmem [shape: bf16[16,128,32], index: 1, kind: input, shape index: {}]   ;;  %s3508_s2 = inlined_call_operand.vmem [shape: f32[1,32], index: 2, kind: input, shape index: {}]   ;;  %s3509_s5 = inlined_call_operand.vmem [shape: bf16[32,128], index: 5, kind: input, shape index: {}]   ;;  %s3510_s3 = inlined_call_operand.vmem [shape: f32[1,32], index: 3, kind: input, shape index: {}]   ;;  %s3511_s4 = inlined_call_operand.vmem [shape: f32[1,32], index: 4, kind: input, shape index: {}]   ;;  %s3512_s6 = inlined_call_operand.vmem [shape: f32[1,128], index: 6, kind: input, shape index: {}]   ;;  %s3513_s7 = inlined_call_operand.vmem [shape: f32[8,128], index: 7, kind: output, shape index: {}]  }
   0x1   :  { %2344 = vmatprep.subr.bf16.mxu0 %v2807_v1  ;;  %2364 = vmatprep.subr.bf16.mxu1 %v2807_v1  ;;  %v27_v2 = vld [vmem:[%s3506_s0] sm:$0xff]  ;;  %v2676_v10 = vld [vmem:[%s3507_s1 + $0x8] sm:$0xff]   ;;  %v2678_v18 = vld [vmem:[%s3507_s1 + $0x10] sm:$0xff]  }
   0x2   :  { %v2856_v3 = vshrl.u32 %v29_v0, 7  ;;  %v2675_v4 = vld [vmem:[%s3507_s1] sm:$0xff]   ;;  %2360 = vmatprep.mubr.msk.bf16.mxu0 %vm2808_vm0, %v2807_v1  ;;  %2380 = vmatprep.mubr.msk.bf16.mxu1 %vm2808_vm0, %v2807_v1  ;;  %v2679_v13 = vld [vmem:[%s3507_s1 + $0x48] sm:$0xff]   ;;  %v2681_v19 = vld [vmem:[%s3507_s1 + $0x50] sm:$0xff]   ;;  %v2954_v45 = vand.u32 127, %v29_v0 }
   0x3   :  { %2345 = vmatpush3.bf16.msra.mxu0 %v2675_v4  ;;  %v2677_v9 = vld [vmem:[%s3507_s1 + $0x40] sm:$0xff]   ;;  %v2680_v23 = vld [vmem:[%s3507_s1 + $0x18] sm:$0xff]   ;;  %v2684_v30 = vld [vmem:[%s3507_s1 + $0x28] sm:$0xff]  }
   0x4   :  { %v33_v5 = vsub.s32 0, %v2856_v3  ;;  %v40_v6 = vsub.s32 1, %v2856_v3  ;;  %v47_v7 = vsub.s32 2, %v2856_v3  ;;  %v54_v8 = vsub.s32 3, %v2856_v3  ;;  %2346 = vmatprep.subr.bf16.mxu0 %v2807_v1  ;;  %2365 = vmatpush3.bf16.msra.mxu1 %v2677_v9  ;;  %v2683_v25 = vld [vmem:[%s3507_s1 + $0x58] sm:$0xff]   ;;  %v2682_v28 = vld [vmem:[%s3507_s1 + $0x20] sm:$0xff]  }
   0x5   :  { %v61_v14 = vsub.s32 4, %v2856_v3  ;;  %v68_v15 = vsub.s32 5, %v2856_v3  ;;  %2366 = vmatprep.subr.bf16.mxu1 %v2807_v1  ;;  %v75_v20 = vsub.s32 6, %v2856_v3  ;;  %v82_v24 = vsub.s32 7, %v2856_v3  ;;  %v2685_v29 = vld [vmem:[%s3507_s1 + $0x60] sm:$0xff]   ;;  %v2687_v31 = vld [vmem:[%s3507_s1 + $0x68] sm:$0xff]  }
   0x6   :  { %v34_v11 = vrot.slane %v27_v2, %v33_v5  ;;  %v48_v12 = vrot.slane %v27_v2, %v47_v7  ;;  %v41_v16 = vrot.slane %v27_v2, %v40_v6  ;;  %v55_v17 = vrot.slane %v27_v2, %v54_v8  ;;  %v28_v32 = vld [vmem:[%s3506_s0 + $0x8] sm:$0xff]  ;;  %v2686_v35 = vld [vmem:[%s3507_s1 + $0x30] sm:$0xff]   ;;  %v2688_v37 = vld [vmem:[%s3507_s1 + $0x38] sm:$0xff]  }
   0x7   :  { %2347 = vmatpush3.bf16.msra.mxu0 %v2676_v10  ;;  %v62_v21 = vrot.slane %v27_v2, %v61_v14  ;;  %v69_v22 = vrot.slane %v27_v2, %v68_v15  ;;  %v76_v26 = vrot.slane %v27_v2, %v75_v20  ;;  %v83_v27 = vrot.slane %v27_v2, %v82_v24  ;;  %v2689_v36 = vld [vmem:[%s3507_s1 + $0x70] sm:$0xff]   ;;  %v2690_v38 = vld [vmem:[%s3507_s1 + $0x78] sm:$0xff]   ;;  %v2691_v47 = vld [vmem:[%s3507_s1 + $0x80] sm:$0xff]  }
   0x8   :  { %36 = vbcast.lane.b32.xlu0 %v34_v11, 256  ;;  %50 = vbcast.lane.b32.xlu1 %v48_v12, 256  ;;  %v90_v33 = vrot.slane %v28_v32, %v33_v5  ;;  %v97_v34 = vrot.slane %v28_v32, %v40_v6  ;;  %v104_v39 = vrot.slane %v28_v32, %v47_v7  ;;  %v2692_v50 = vld [vmem:[%s3507_s1 + $0x88] sm:$0xff]   ;;  %v2693_v51 = vld [vmem:[%s3507_s1 + $0xc0] sm:$0xff]   ;;  %v2694_v52 = vld [vmem:[%s3507_s1 + $0x90] sm:$0xff]  }
   0x9   :  { %2348 = vmatprep.subr.bf16.mxu0 %v2807_v1  ;;  %2367 = vmatpush3.bf16.msra.mxu1 %v2679_v13  ;;  %v111_v40 = vrot.slane %v28_v32, %v54_v8  ;;  %v118_v41 = vrot.slane %v28_v32, %v61_v14  ;;  %v125_v42 = vrot.slane %v28_v32, %v68_v15  ;;  %v2695_v53 = vld [vmem:[%s3507_s1 + $0xc8] sm:$0xff]   ;;  %v2696_v54 = vld [vmem:[%s3507_s1 + $0x98] sm:$0xff]   ;;  %v2697_v55 = vld [vmem:[%s3507_s1 + $0xd0] sm:$0xff]  }
   0xa   :  { %2368 = vmatprep.subr.bf16.mxu1 %v2807_v1  ;;  %v132_v43 = vrot.slane %v28_v32, %v75_v20  ;;  %v139_v44 = vrot.slane %v28_v32, %v82_v24  ;;  %v2698_v56 = vld [vmem:[%s3507_s1 + $0xa0] sm:$0xff]   ;;  %v2699_v57 = vld [vmem:[%s3507_s1 + $0xd8] sm:$0xff]   ;;  %v2700_v58 = vld [vmem:[%s3507_s1 + $0xa8] sm:$0xff]  }
   0xb   :  { %2349 = vmatpush3.bf16.msra.mxu0 %v2678_v18  ;;  %v2701_v59 = vld [vmem:[%s3507_s1 + $0xe0] sm:$0xff]   ;;  %v2702_v60 = vld [vmem:[%s3507_s1 + $0xb0] sm:$0xff]   ;;  %v2703_v61 = vld [vmem:[%s3507_s1 + $0xe8] sm:$0xff]  }
   0xc   :  { %43 = vbcast.lane.b32.xlu0 %v41_v16, 256  ;;  %57 = vbcast.lane.b32.xlu1 %v55_v17, 256  ;;  %v2704_v63 = vld [vmem:[%s3507_s1 + $0xb8] sm:$0xff]   ;;  %v2705_v0 = vld [vmem:[%s3507_s1 + $0xf0] sm:$0xff]   ;;  %v2707_v4 = vld [vmem:[%s3507_s1 + $0x100] sm:$0xff]  }
   0xd   :  { %2350 = vmatprep.subr.bf16.mxu0 %v2807_v1  ;;  %2369 = vmatpush3.bf16.msra.mxu1 %v2681_v19  ;;  %v2706_v3 = vld [vmem:[%s3507_s1 + $0xf8] sm:$0xff]   ;;  %v2708_v5 = vld [vmem:[%s3507_s1 + $0x108] sm:$0xff]   ;;  %v2709_v6 = vld [vmem:[%s3507_s1 + $0x140] sm:$0xff]  }
   0xe   :  { %2370 = vmatprep.subr.bf16.mxu1 %v2807_v1  ;;  %v2710_v7 = vld [vmem:[%s3507_s1 + $0x110] sm:$0xff]   ;;  %v2711_v8 = vld [vmem:[%s3507_s1 + $0x148] sm:$0xff]   ;;  %v2712_v9 = vld [vmem:[%s3507_s1 + $0x118] sm:$0xff]  }
   0xf   :  { %2351 = vmatpush3.bf16.msra.mxu0 %v2680_v23  ;;  %v2713_v10 = vld [vmem:[%s3507_s1 + $0x150] sm:$0xff]   ;;  %v2714_v11 = vld [vmem:[%s3507_s1 + $0x120] sm:$0xff]   ;;  %v2715_v12 = vld [vmem:[%s3507_s1 + $0x158] sm:$0xff]  }
  0x10   :  { %64 = vbcast.lane.b32.xlu0 %v62_v21, 256  ;;  %71 = vbcast.lane.b32.xlu1 %v69_v22, 256  ;;  %v2716_v13 = vld [vmem:[%s3507_s1 + $0x128] sm:$0xff]   ;;  %v2717_v14 = vld [vmem:[%s3507_s1 + $0x160] sm:$0xff]   ;;  %v2718_v15 = vld [vmem:[%s3507_s1 + $0x130] sm:$0xff]  }
  0x11   :  { %2352 = vmatprep.subr.bf16.mxu0 %v2807_v1  ;;  %2371 = vmatpush3.bf16.msra.mxu1 %v2683_v25  ;;  %v2719_v16 = vld [vmem:[%s3507_s1 + $0x168] sm:$0xff]   ;;  %v2720_v18 = vld [vmem:[%s3507_s1 + $0x138] sm:$0xff]   ;;  %v2721_v19 = vld [vmem:[%s3507_s1 + $0x170] sm:$0xff]  }
  0x12   :  { %2372 = vmatprep.subr.bf16.mxu1 %v2807_v1  ;;  %v2722_v21 = vld [vmem:[%s3507_s1 + $0x178] sm:$0xff]   ;;  %v2723_v22 = vld [vmem:[%s3507_s1 + $0x180] sm:$0xff]   ;;  %v2724_v23 = vld [vmem:[%s3507_s1 + $0x188] sm:$0xff]  }
  0x13   :  { %2353 = vmatpush3.bf16.msra.mxu0 %v2682_v28  ;;  %v2725_v24 = vld [vmem:[%s3507_s1 + $0x1c0] sm:$0xff]   ;;  %v2726_v25 = vld [vmem:[%s3507_s1 + $0x190] sm:$0xff]  }
  0x14   :  { %78 = vbcast.lane.b32.xlu0 %v76_v26, 256  ;;  %85 = vbcast.lane.b32.xlu1 %v83_v27, 256  ;;  %v2727_v26 = vld [vmem:[%s3507_s1 + $0x1c8] sm:$0xff]   ;;  %v2728_v27 = vld [vmem:[%s3507_s1 + $0x198] sm:$0xff]   ;;  %v2729_v28 = vld [vmem:[%s3507_s1 + $0x1d0] sm:$0xff]  }
  0x15   :  { %2354 = vmatprep.subr.bf16.mxu0 %v2807_v1  ;;  %2373 = vmatpush3.bf16.msra.mxu1 %v2685_v29  ;;  %v2730_v29 = vld [vmem:[%s3507_s1 + $0x1a0] sm:$0xff]  }
  0x16   :  { %2374 = vmatprep.subr.bf16.mxu1 %v2807_v1  ;;  %v2733_v32 = vld [vmem:[%s3507_s1 + $0x1e0] sm:$0xff]  }
  0x17   :  { %2355 = vmatpush3.bf16.msra.mxu0 %v2684_v30  ;;  %v2731_v30 = vld [vmem:[%s3507_s1 + $0x1d8] sm:$0xff]  }
  0x18   :  { %2356 = vmatprep.subr.bf16.mxu0 %v2807_v1  ;;  %92 = vbcast.lane.b32.xlu0 %v90_v33, 256  ;;  %v2734_v33 = vld [vmem:[%s3507_s1 + $0x1b0] sm:$0xff]  }
  0x19   :  { %2375 = vmatpush3.bf16.msra.mxu1 %v2687_v31  ;;  %99 = vbcast.lane.b32.xlu1 %v97_v34, 256  ;;  %v2732_v31 = vld [vmem:[%s3507_s1 + $0x1a8] sm:$0xff]  }
  0x1a   :  { %2376 = vmatprep.subr.bf16.mxu1 %v2807_v1  ;;  %v2735_v34 = vld [vmem:[%s3507_s1 + $0x1e8] sm:$0xff]  }
  0x1b   :  { %2357 = vmatpush3.bf16.msra.mxu0 %v2686_v35 }
  0x1c   :  { %2358 = vmatprep.subr.bf16.mxu0 %v2807_v1  ;;  %106 = vbcast.lane.b32.xlu0 %v104_v39, 256  ;;  %v2738_v39 = vld [vmem:[%s3507_s1 + $0x1f8] sm:$0xff]  }
  0x1d   :  { %2377 = vmatpush3.bf16.msra.mxu1 %v2689_v36  ;;  %113 = vbcast.lane.b32.xlu1 %v111_v40, 256  ;;  %v2736_v36 = vld [vmem:[%s3507_s1 + $0x1b8] sm:$0xff]   ;;  %v2739_v40 = vld [vmem:[%s3507_s1 + $0x200] sm:$0xff]  }
  0x1e   :  { %2378 = vmatprep.subr.bf16.mxu1 %v2807_v1 }
  0x1f   :  { %2359 = vmatpush3.bf16.msra.mxu0 %v2688_v37  ;;  %v2737_v37 = vld [vmem:[%s3507_s1 + $0x1f0] sm:$0xff]  }
  0x20   :  { %2384 = vmatprep.subr.bf16.mxu0 %v2807_v1  ;;  %120 = vbcast.lane.b32.xlu0 %v118_v41, 256  ;;  %v2740_v41 = vld [vmem:[%s3507_s1 + $0x208] sm:$0xff]  }
  0x21   :  { %2379 = vmatpush3.bf16.msra.mxu1 %v2690_v38  ;;  %127 = vbcast.lane.b32.xlu1 %v125_v42, 256  ;;  %v2741_v42 = vld [vmem:[%s3507_s1 + $0x240] sm:$0xff]  }
  0x22   :  { %2404 = vmatprep.subr.bf16.mxu1 %v2807_v1 }
  0x24   :  { %134 = vbcast.lane.b32.xlu0 %v132_v43, 256  ;;  %v2742_v43 = vld [vmem:[%s3507_s1 + $0x210] sm:$0xff]  }
  0x25   :  { %141 = vbcast.lane.b32.xlu1 %v139_v44, 256  ;;  %v2743_v44 = vld [vmem:[%s3507_s1 + $0x248] sm:$0xff]  }
  0x7a   :  { %v37_v46 = vpop.permute.xlu0 %36  ;;  %v51_v62 = vpop.permute.xlu1 %50 }
  0x7b   :  { %vm143_vm1 = vcmp.eq.s32.totalorder %v2954_v45, %v37_v46  ;;  %vm145_vm5 = vcmp.eq.s32.totalorder %v2954_v45, %v51_v62  ;;  %v2744_v46 = vld [vmem:[%s3507_s1 + $0x218] sm:$0xff]   ;;  %v2757_v62 = vld [vmem:[%s3507_s1 + $0x2c0] sm:$0xff]  }
  0x7c   :  { %vm2038_vm2 = vmpackc.low %vm143_vm1, %vm143_vm1 }
  0x7d   :  { %2361 = vmatmul.mubr.msk.bf16.vlgmr.msra.gmra.mrb[0].mxu0 %vm2038_vm2, %v2809_v48  ;;  %vm2058_vm6 = vmpackc.low %vm145_vm5, %vm145_vm5 }
  0x7e   :  { %2385 = vmatpush3.bf16.msra.mxu0 %v2691_v47  ;;  %v44_v49 = vpop.permute.xlu0 %43  ;;  %2400 = vmatprep.mubr.msk.bf16.mxu0 %vm2808_vm0, %v2807_v1  ;;  %v58_v2 = vpop.permute.xlu1 %57  ;;  %v2745_v47 = vld [vmem:[%s3507_s1 + $0x250] sm:$0xff]  }
  0x7f   :  { %vm144_vm3 = vcmp.eq.s32.totalorder %v2954_v45, %v44_v49  ;;  %2386 = vmatprep.subr.bf16.mxu0 %v2807_v1  ;;  %vm146_vm7 = vcmp.eq.s32.totalorder %v2954_v45, %v58_v2  ;;  %v2746_v49 = vld [vmem:[%s3507_s1 + $0x220] sm:$0xff]   ;;  %v2760_v2 = vld [vmem:[%s3507_s1 + $0x298] sm:$0xff]  }
  0x80   :  { %vm2048_vm4 = vmpackc.low %vm144_vm3, %vm144_vm3 }
  0x81   :  { %2381 = vmatmul.mubr.msk.bf16.vlgmr.msra.gmra.mrb[0].mxu1 %vm2048_vm4, %v2809_v48  ;;  %vm2068_vm8 = vmpackc.low %vm146_vm7, %vm146_vm7 }
  0x82   :  { %2387 = vmatpush3.bf16.msra.mxu0 %v2692_v50  ;;  %2405 = vmatpush3.bf16.msra.mxu1 %v2693_v51  ;;  %v65_v17 = vpop.permute.xlu0 %64  ;;  %v72_v20 = vpop.permute.xlu1 %71  ;;  %v2747_v50 = vld [vmem:[%s3507_s1 + $0x258] sm:$0xff]   ;;  %v2748_v51 = vld [vmem:[%s3507_s1 + $0x228] sm:$0xff]  }
  0x83   :  { %2388 = vmatprep.subr.bf16.mxu0 %v2807_v1  ;;  %2406 = vmatprep.subr.bf16.mxu1 %v2807_v1  ;;  %vm147_vm9 = vcmp.eq.s32.totalorder %v2954_v45, %v65_v17  ;;  %vm148_vm11 = vcmp.eq.s32.totalorder %v2954_v45, %v72_v20  ;;  %v2773_v17 = vld [vmem:[%s3507_s1 + $0x340] sm:$0xff]   ;;  %v2776_v20 = vld [vmem:[%s3507_s1 + $0x318] sm:$0xff]  }
  0x84   :  { %2420 = vmatprep.mubr.msk.bf16.mxu1 %vm2808_vm0, %v2807_v1  ;;  %vm2078_vm10 = vmpackc.low %vm147_vm9, %vm147_vm9 }
  0x85   :  { %vm2088_vm12 = vmpackc.low %vm148_vm11, %vm148_vm11 }
  0x86   :  { %2389 = vmatpush3.bf16.msra.mxu0 %v2694_v52  ;;  %2407 = vmatpush3.bf16.msra.mxu1 %v2695_v53  ;;  %v79_v35 = vpop.permute.xlu0 %78  ;;  %v86_v38 = vpop.permute.xlu1 %85  ;;  %v2749_v52 = vld [vmem:[%s3507_s1 + $0x260] sm:$0xff]   ;;  %v2750_v53 = vld [vmem:[%s3507_s1 + $0x230] sm:$0xff]  }
  0x87   :  { %2390 = vmatprep.subr.bf16.mxu0 %v2807_v1  ;;  %2408 = vmatprep.subr.bf16.mxu1 %v2807_v1  ;;  %vm149_vm13 = vcmp.eq.s32.totalorder %v2954_v45, %v79_v35  ;;  %vm150_vm15 = vcmp.eq.s32.totalorder %v2954_v45, %v86_v38  ;;  %v2789_v35 = vld [vmem:[%s3507_s1 + $0x3c0] sm:$0xff]   ;;  %v2792_v38 = vld [vmem:[%s3507_s1 + $0x398] sm:$0xff]  }
  0x88   :  { %vm2098_vm14 = vmpackc.low %vm149_vm13, %vm149_vm13 }
  0x89   :  { %vm2108_vm1 = vmpackc.low %vm150_vm15, %vm150_vm15 }
  0x8a   :  { %2391 = vmatpush3.bf16.msra.mxu0 %v2696_v54  ;;  %2409 = vmatpush3.bf16.msra.mxu1 %v2697_v55  ;;  %v2751_v54 = vld [vmem:[%s3507_s1 + $0x268] sm:$0xff]   ;;  %v93_v55 = vpop.permute.xlu0 %92 }
  0x8b   :  { %2392 = vmatprep.subr.bf16.mxu0 %v2807_v1  ;;  %2410 = vmatprep.subr.bf16.mxu1 %v2807_v1  ;;  %vm151_vm2 = vcmp.eq.s32.totalorder %v2954_v45, %v93_v55 }
  0x8c   :  { %vm2118_vm3 = vmpackc.low %vm151_vm2, %vm151_vm2 }
  0x8e   :  { %2393 = vmatpush3.bf16.msra.mxu0 %v2698_v56  ;;  %2411 = vmatpush3.bf16.msra.mxu1 %v2699_v57  ;;  %v2752_v56 = vld [vmem:[%s3507_s1 + $0x238] sm:$0xff]   ;;  %v2753_v57 = vld [vmem:[%s3507_s1 + $0x270] sm:$0xff]  }
  0x8f   :  { %2394 = vmatprep.subr.bf16.mxu0 %v2807_v1  ;;  %2412 = vmatprep.subr.bf16.mxu1 %v2807_v1 }
  0x92   :  { %2395 = vmatpush3.bf16.msra.mxu0 %v2700_v58  ;;  %2413 = vmatpush3.bf16.msra.mxu1 %v2701_v59  ;;  %v100_v58 = vpop.permute.xlu1 %99  ;;  %v2754_v59 = vld [vmem:[%s3507_s1 + $0x278] sm:$0xff]  }
  0x93   :  { %2396 = vmatprep.subr.bf16.mxu0 %v2807_v1  ;;  %2414 = vmatprep.subr.bf16.mxu1 %v2807_v1  ;;  %vm152_vm4 = vcmp.eq.s32.totalorder %v2954_v45, %v100_v58 }
  0x94   :  { %vm2128_vm5 = vmpackc.low %vm152_vm4, %vm152_vm4 }
  0x96   :  { %2397 = vmatpush3.bf16.msra.mxu0 %v2702_v60  ;;  %2415 = vmatpush3.bf16.msra.mxu1 %v2703_v61  ;;  %v2755_v60 = vld [vmem:[%s3507_s1 + $0x280] sm:$0xff]   ;;  %v2756_v61 = vld [vmem:[%s3507_s1 + $0x288] sm:$0xff]  }
  0x97   :  { %2398 = vmatprep.subr.bf16.mxu0 %v2807_v1  ;;  %2416 = vmatprep.subr.bf16.mxu1 %v2807_v1 }
  0x9a   :  { %2399 = vmatpush3.bf16.msra.mxu0 %v2704_v63  ;;  %2417 = vmatpush3.bf16.msra.mxu1 %v2705_v0  ;;  %v2758_v63 = vld [vmem:[%s3507_s1 + $0x290] sm:$0xff]   ;;  %v2759_v0 = vld [vmem:[%s3507_s1 + $0x2c8] sm:$0xff]  }
  0x9b   :  { %2418 = vmatprep.subr.bf16.mxu1 %v2807_v1  ;;  %2424 = vmatprep.subr.bf16.mxu0 %v2807_v1 }
  0x9d   :  { %2401 = vmatmul.mubr.msk.bf16.vlgmr.msra.gmra.mrb[4].mxu0 %vm2058_vm6, %v2809_v48 }
  0x9e   :  { %2419 = vmatpush3.bf16.msra.mxu1 %v2706_v3  ;;  %2425 = vmatpush3.bf16.msra.mxu0 %v2707_v4  ;;  %v2761_v3 = vld [vmem:[%s3507_s1 + $0x2d0] sm:$0xff]   ;;  %v2762_v4 = vld [vmem:[%s3507_s1 + $0x2a0] sm:$0xff]  }
  0x9f   :  { %2426 = vmatprep.subr.bf16.mxu0 %v2807_v1  ;;  %2444 = vmatprep.subr.bf16.mxu1 %v2807_v1 }
  0xa0   :  { %2440 = vmatprep.mubr.msk.bf16.mxu0 %vm2808_vm0, %v2807_v1 }
  0xa1   :  { %2421 = vmatmul.mubr.msk.bf16.vlgmr.msra.gmra.mrb[4].mxu1 %vm2068_vm8, %v2809_v48 }
  0xa2   :  { %2427 = vmatpush3.bf16.msra.mxu0 %v2708_v5  ;;  %2445 = vmatpush3.bf16.msra.mxu1 %v2709_v6  ;;  %v2763_v5 = vld [vmem:[%s3507_s1 + $0x2d8] sm:$0xff]   ;;  %v2764_v6 = vld [vmem:[%s3507_s1 + $0x2a8] sm:$0xff]  }
  0xa3   :  { %2428 = vmatprep.subr.bf16.mxu0 %v2807_v1  ;;  %2446 = vmatprep.subr.bf16.mxu1 %v2807_v1 }
  0xa4   :  { %2460 = vmatprep.mubr.msk.bf16.mxu1 %vm2808_vm0, %v2807_v1 }
  0xa6   :  { %2429 = vmatpush3.bf16.msra.mxu0 %v2710_v7  ;;  %2447 = vmatpush3.bf16.msra.mxu1 %v2711_v8  ;;  %v2765_v7 = vld [vmem:[%s3507_s1 + $0x2e0] sm:$0xff]   ;;  %v2766_v8 = vld [vmem:[%s3507_s1 + $0x2b0] sm:$0xff]  }
  0xa7   :  { %2430 = vmatprep.subr.bf16.mxu0 %v2807_v1  ;;  %2448 = vmatprep.subr.bf16.mxu1 %v2807_v1 }
  0xaa   :  { %2431 = vmatpush3.bf16.msra.mxu0 %v2712_v9  ;;  %2449 = vmatpush3.bf16.msra.mxu1 %v2713_v10  ;;  %v2767_v9 = vld [vmem:[%s3507_s1 + $0x2e8] sm:$0xff]   ;;  %v107_v10 = vpop.permute.xlu0 %106 }
  0xab   :  { %2432 = vmatprep.subr.bf16.mxu0 %v2807_v1  ;;  %2450 = vmatprep.subr.bf16.mxu1 %v2807_v1  ;;  %vm153_vm6 = vcmp.eq.s32.totalorder %v2954_v45, %v107_v10 }
  0xac   :  { %vm2138_vm7 = vmpackc.low %vm153_vm6, %vm153_vm6 }
  0xae   :  { %2433 = vmatpush3.bf16.msra.mxu0 %v2714_v11  ;;  %2451 = vmatpush3.bf16.msra.mxu1 %v2715_v12  ;;  %v2768_v11 = vld [vmem:[%s3507_s1 + $0x2b8] sm:$0xff]   ;;  %v2769_v12 = vld [vmem:[%s3507_s1 + $0x2f0] sm:$0xff]  }
  0xaf   :  { %2434 = vmatprep.subr.bf16.mxu0 %v2807_v1  ;;  %2452 = vmatprep.subr.bf16.mxu1 %v2807_v1 }
  0xb2   :  { %2435 = vmatpush3.bf16.msra.mxu0 %v2716_v13  ;;  %2453 = vmatpush3.bf16.msra.mxu1 %v2717_v14  ;;  %v114_v13 = vpop.permute.xlu1 %113  ;;  %v2770_v14 = vld [vmem:[%s3507_s1 + $0x2f8] sm:$0xff]  }
  0xb3   :  { %2436 = vmatprep.subr.bf16.mxu0 %v2807_v1  ;;  %2454 = vmatprep.subr.bf16.mxu1 %v2807_v1  ;;  %vm154_vm8 = vcmp.eq.s32.totalorder %v2954_v45, %v114_v13 }
  0xb4   :  { %vm2148_vm9 = vmpackc.low %vm154_vm8, %vm154_vm8 }
  0xb6   :  { %2437 = vmatpush3.bf16.msra.mxu0 %v2718_v15  ;;  %2455 = vmatpush3.bf16.msra.mxu1 %v2719_v16  ;;  %v2771_v15 = vld [vmem:[%s3507_s1 + $0x300] sm:$0xff]   ;;  %v2772_v16 = vld [vmem:[%s3507_s1 + $0x308] sm:$0xff]  }
  0xb7   :  { %2438 = vmatprep.subr.bf16.mxu0 %v2807_v1  ;;  %2456 = vmatprep.subr.bf16.mxu1 %v2807_v1 }
  0xba   :  { %2439 = vmatpush3.bf16.msra.mxu0 %v2720_v18  ;;  %2457 = vmatpush3.bf16.msra.mxu1 %v2721_v19  ;;  %v2774_v18 = vld [vmem:[%s3507_s1 + $0x310] sm:$0xff]   ;;  %v2775_v19 = vld [vmem:[%s3507_s1 + $0x348] sm:$0xff]  }
  0xbb   :  { %2458 = vmatprep.subr.bf16.mxu1 %v2807_v1  ;;  %2464 = vmatprep.subr.bf16.mxu0 %v2807_v1 }
  0xbd   :  { %2441 = vmatmul.mubr.msk.bf16.vlgmr.msra.gmra.mrb[8].mxu0 %vm2078_vm10, %v2809_v48 }
  0xbe   :  { %2459 = vmatpush3.bf16.msra.mxu1 %v2722_v21  ;;  %2465 = vmatpush3.bf16.msra.mxu0 %v2723_v22  ;;  %v2777_v21 = vld [vmem:[%s3507_s1 + $0x350] sm:$0xff]   ;;  %v2778_v22 = vld [vmem:[%s3507_s1 + $0x320] sm:$0xff]  }
  0xbf   :  { %2466 = vmatprep.subr.bf16.mxu0 %v2807_v1  ;;  %2484 = vmatprep.subr.bf16.mxu1 %v2807_v1 }
  0xc0   :  { %2480 = vmatprep.mubr.msk.bf16.mxu0 %vm2808_vm0, %v2807_v1 }
  0xc1   :  { %2461 = vmatmul.mubr.msk.bf16.vlgmr.msra.gmra.mrb[8].mxu1 %vm2088_vm12, %v2809_v48 }
  0xc2   :  { %2467 = vmatpush3.bf16.msra.mxu0 %v2724_v23  ;;  %2485 = vmatpush3.bf16.msra.mxu1 %v2725_v24  ;;  %v2779_v23 = vld [vmem:[%s3507_s1 + $0x358] sm:$0xff]   ;;  %v2780_v24 = vld [vmem:[%s3507_s1 + $0x328] sm:$0xff]  }
  0xc3   :  { %2468 = vmatprep.subr.bf16.mxu0 %v2807_v1  ;;  %2486 = vmatprep.subr.bf16.mxu1 %v2807_v1 }
  0xc4   :  { %2500 = vmatprep.mubr.msk.bf16.mxu1 %vm2808_vm0, %v2807_v1 }
  0xc6   :  { %2469 = vmatpush3.bf16.msra.mxu0 %v2726_v25  ;;  %2487 = vmatpush3.bf16.msra.mxu1 %v2727_v26  ;;  %v2781_v25 = vld [vmem:[%s3507_s1 + $0x360] sm:$0xff]   ;;  %v2782_v26 = vld [vmem:[%s3507_s1 + $0x330] sm:$0xff]  }
  0xc7   :  { %2470 = vmatprep.subr.bf16.mxu0 %v2807_v1  ;;  %2488 = vmatprep.subr.bf16.mxu1 %v2807_v1 }
  0xca   :  { %2471 = vmatpush3.bf16.msra.mxu0 %v2728_v27  ;;  %2489 = vmatpush3.bf16.msra.mxu1 %v2729_v28  ;;  %v2783_v27 = vld [vmem:[%s3507_s1 + $0x368] sm:$0xff]   ;;  %v121_v28 = vpop.permute.xlu0 %120 }
  0xcb   :  { %2472 = vmatprep.subr.bf16.mxu0 %v2807_v1  ;;  %2490 = vmatprep.subr.bf16.mxu1 %v2807_v1  ;;  %vm155_vm10 = vcmp.eq.s32.totalorder %v2954_v45, %v121_v28 }
  0xcc   :  { %vm2158_vm11 = vmpackc.low %vm155_vm10, %vm155_vm10 }
  0xce   :  { %2473 = vmatpush3.bf16.msra.mxu0 %v2730_v29  ;;  %2491 = vmatpush3.bf16.msra.mxu1 %v2731_v30  ;;  %v2784_v29 = vld [vmem:[%s3507_s1 + $0x338] sm:$0xff]   ;;  %v2785_v30 = vld [vmem:[%s3507_s1 + $0x370] sm:$0xff]  }
  0xcf   :  { %2474 = vmatprep.subr.bf16.mxu0 %v2807_v1  ;;  %2492 = vmatprep.subr.bf16.mxu1 %v2807_v1 }
  0xd2   :  { %2475 = vmatpush3.bf16.msra.mxu0 %v2732_v31  ;;  %2493 = vmatpush3.bf16.msra.mxu1 %v2733_v32  ;;  %v128_v31 = vpop.permute.xlu1 %127  ;;  %v2786_v32 = vld [vmem:[%s3507_s1 + $0x378] sm:$0xff]  }
  0xd3   :  { %2476 = vmatprep.subr.bf16.mxu0 %v2807_v1  ;;  %2494 = vmatprep.subr.bf16.mxu1 %v2807_v1  ;;  %vm156_vm12 = vcmp.eq.s32.totalorder %v2954_v45, %v128_v31 }
  0xd4   :  { %vm2168_vm13 = vmpackc.low %vm156_vm12, %vm156_vm12 }
  0xd6   :  { %2477 = vmatpush3.bf16.msra.mxu0 %v2734_v33  ;;  %2495 = vmatpush3.bf16.msra.mxu1 %v2735_v34  ;;  %v2787_v33 = vld [vmem:[%s3507_s1 + $0x380] sm:$0xff]   ;;  %v2788_v34 = vld [vmem:[%s3507_s1 + $0x388] sm:$0xff]  }
  0xd7   :  { %2478 = vmatprep.subr.bf16.mxu0 %v2807_v1  ;;  %2496 = vmatprep.subr.bf16.mxu1 %v2807_v1 }
  0xda   :  { %2479 = vmatpush3.bf16.msra.mxu0 %v2736_v36  ;;  %2497 = vmatpush3.bf16.msra.mxu1 %v2737_v37  ;;  %v2790_v36 = vld [vmem:[%s3507_s1 + $0x390] sm:$0xff]   ;;  %v2791_v37 = vld [vmem:[%s3507_s1 + $0x3c8] sm:$0xff]  }
  0xdb   :  { %2498 = vmatprep.subr.bf16.mxu1 %v2807_v1  ;;  %2504 = vmatprep.subr.bf16.mxu0 %v2807_v1 }
  0xdd   :  { %2481 = vmatmul.mubr.msk.bf16.vlgmr.msra.gmra.mrb[12].mxu0 %vm2098_vm14, %v2809_v48  ;;  %vm1871_vm14 = vcmask 261120  }
  0xde   :  { %2499 = vmatpush3.bf16.msra.mxu1 %v2738_v39  ;;  %2505 = vmatpush3.bf16.msra.mxu0 %v2739_v40  ;;  %v2793_v39 = vld [vmem:[%s3507_s1 + $0x3d0] sm:$0xff]   ;;  %v2794_v40 = vld [vmem:[%s3507_s1 + $0x3a0] sm:$0xff]  }
  0xdf   :  { %2506 = vmatprep.subr.bf16.mxu0 %v2807_v1  ;;  %2524 = vmatprep.subr.bf16.mxu1 %v2807_v1 }
  0xe0   :  { %2520 = vmatprep.mubr.msk.bf16.mxu0 %vm2808_vm0, %v2807_v1 }
  0xe1   :  { %2501 = vmatmul.mubr.msk.bf16.vlgmr.msra.gmra.mrb[12].mxu1 %vm2108_vm1, %v2809_v48 }
  0xe2   :  { %2507 = vmatpush3.bf16.msra.mxu0 %v2740_v41  ;;  %2525 = vmatpush3.bf16.msra.mxu1 %v2741_v42  ;;  %v2795_v41 = vld [vmem:[%s3507_s1 + $0x3d8] sm:$0xff]   ;;  %v2796_v42 = vld [vmem:[%s3507_s1 + $0x3a8] sm:$0xff]  }
  0xe3   :  { %2508 = vmatprep.subr.bf16.mxu0 %v2807_v1  ;;  %2526 = vmatprep.subr.bf16.mxu1 %v2807_v1 }
  0xe4   :  { %2540 = vmatprep.mubr.msk.bf16.mxu1 %vm2808_vm0, %v2807_v1 }
  0xe6   :  { %2509 = vmatpush3.bf16.msra.mxu0 %v2742_v43  ;;  %2527 = vmatpush3.bf16.msra.mxu1 %v2743_v44  ;;  %v2797_v43 = vld [vmem:[%s3507_s1 + $0x3e0] sm:$0xff]  }
  0xe7   :  { %2510 = vmatprep.subr.bf16.mxu0 %v2807_v1  ;;  %2528 = vmatprep.subr.bf16.mxu1 %v2807_v1 }
  0xea   :  { %2511 = vmatpush3.bf16.msra.mxu0 %v2744_v46  ;;  %2529 = vmatpush3.bf16.msra.mxu1 %v2745_v47 }
  0xeb   :  { %2512 = vmatprep.subr.bf16.mxu0 %v2807_v1  ;;  %2530 = vmatprep.subr.bf16.mxu1 %v2807_v1 }
  0xee   :  { %2513 = vmatpush3.bf16.msra.mxu0 %v2746_v49  ;;  %2531 = vmatpush3.bf16.msra.mxu1 %v2747_v50  ;;  %v2798_v49 = vld [vmem:[%s3507_s1 + $0x3b0] sm:$0xff]   ;;  %v2799_v50 = vld [vmem:[%s3507_s1 + $0x3e8] sm:$0xff]  }
  0xef   :  { %2514 = vmatprep.subr.bf16.mxu0 %v2807_v1  ;;  %2532 = vmatprep.subr.bf16.mxu1 %v2807_v1 }
  0xf2   :  { %2515 = vmatpush3.bf16.msra.mxu0 %v2748_v51  ;;  %2533 = vmatpush3.bf16.msra.mxu1 %v2749_v52 }
  0xf3   :  { %2516 = vmatprep.subr.bf16.mxu0 %v2807_v1  ;;  %2534 = vmatprep.subr.bf16.mxu1 %v2807_v1 }
  0xf6   :  { %2517 = vmatpush3.bf16.msra.mxu0 %v2750_v53  ;;  %2535 = vmatpush3.bf16.msra.mxu1 %v2751_v54  ;;  %v135_v53 = vpop.permute.xlu0 %134 }
  0xf7   :  { %2518 = vmatprep.subr.bf16.mxu0 %v2807_v1  ;;  %2536 = vmatprep.subr.bf16.mxu1 %v2807_v1  ;;  %vm157_vm15 = vcmp.eq.s32.totalorder %v2954_v45, %v135_v53 }
  0xf8   :  { %vm2178_vm1 = vmpackc.low %vm157_vm15, %vm157_vm15 }
  0xfa   :  { %2519 = vmatpush3.bf16.msra.mxu0 %v2752_v56  ;;  %2537 = vmatpush3.bf16.msra.mxu1 %v2753_v57 }
  0xfb   :  { %2538 = vmatprep.subr.bf16.mxu1 %v2807_v1  ;;  %2544 = vmatprep.subr.bf16.mxu0 %v2807_v1 }
  0xfd   :  { %2521 = vmatmul.mubr.msk.bf16.vlgmr.msra.gmra.mrb[16].mxu0 %vm2118_vm3, %v2809_v48 }
  0xfe   :  { %2539 = vmatpush3.bf16.msra.mxu1 %v2754_v59  ;;  %2545 = vmatpush3.bf16.msra.mxu0 %v2755_v60  ;;  %v2800_v59 = vld [vmem:[%s3507_s1 + $0x3b8] sm:$0xff]   ;;  %v2801_v60 = vld [vmem:[%s3507_s1 + $0x3f0] sm:$0xff]  }
  0xff   :  { %2546 = vmatprep.subr.bf16.mxu0 %v2807_v1  ;;  %2564 = vmatprep.subr.bf16.mxu1 %v2807_v1 }
 0x100   :  { %2560 = vmatprep.mubr.msk.bf16.mxu0 %vm2808_vm0, %v2807_v1 }
 0x101   :  { %2541 = vmatmul.mubr.msk.bf16.vlgmr.msra.gmra.mrb[16].mxu1 %vm2128_vm5, %v2809_v48 }
 0x102   :  { %2547 = vmatpush3.bf16.msra.mxu0 %v2756_v61  ;;  %2565 = vmatpush3.bf16.msra.mxu1 %v2757_v62  ;;  %v142_v62 = vpop.permute.xlu1 %141 }
 0x103   :  { %2548 = vmatprep.subr.bf16.mxu0 %v2807_v1  ;;  %2566 = vmatprep.subr.bf16.mxu1 %v2807_v1  ;;  %vm158_vm2 = vcmp.eq.s32.totalorder %v2954_v45, %v142_v62 }
 0x104   :  { %2580 = vmatprep.mubr.msk.bf16.mxu1 %vm2808_vm0, %v2807_v1  ;;  %vm2188_vm3 = vmpackc.low %vm158_vm2, %vm158_vm2 }
 0x106   :  { %2549 = vmatpush3.bf16.msra.mxu0 %v2758_v63  ;;  %2567 = vmatpush3.bf16.msra.mxu1 %v2759_v0  ;;  %v2802_v63 = vld [vmem:[%s3507_s1 + $0x3f8] sm:$0xff]  }
 0x107   :  { %2550 = vmatprep.subr.bf16.mxu0 %v2807_v1  ;;  %2568 = vmatprep.subr.bf16.mxu1 %v2807_v1 }
 0x10a   :  { %2551 = vmatpush3.bf16.msra.mxu0 %v2760_v2  ;;  %2569 = vmatpush3.bf16.msra.mxu1 %v2761_v3 }
 0x10b   :  { %2552 = vmatprep.subr.bf16.mxu0 %v2807_v1  ;;  %2570 = vmatprep.subr.bf16.mxu1 %v2807_v1 }
 0x10e   :  { %2553 = vmatpush3.bf16.msra.mxu0 %v2762_v4  ;;  %2571 = vmatpush3.bf16.msra.mxu1 %v2763_v5 }
 0x10f   :  { %2554 = vmatprep.subr.bf16.mxu0 %v2807_v1  ;;  %2572 = vmatprep.subr.bf16.mxu1 %v2807_v1 }
 0x112   :  { %2555 = vmatpush3.bf16.msra.mxu0 %v2764_v6  ;;  %2573 = vmatpush3.bf16.msra.mxu1 %v2765_v7 }
 0x113   :  { %2556 = vmatprep.subr.bf16.mxu0 %v2807_v1  ;;  %2574 = vmatprep.subr.bf16.mxu1 %v2807_v1 }
 0x116   :  { %2557 = vmatpush3.bf16.msra.mxu0 %v2766_v8  ;;  %2575 = vmatpush3.bf16.msra.mxu1 %v2767_v9 }
 0x117   :  { %2558 = vmatprep.subr.bf16.mxu0 %v2807_v1  ;;  %2576 = vmatprep.subr.bf16.mxu1 %v2807_v1 }
 0x11a   :  { %2559 = vmatpush3.bf16.msra.mxu0 %v2768_v11  ;;  %2577 = vmatpush3.bf16.msra.mxu1 %v2769_v12 }
 0x11b   :  { %2578 = vmatprep.subr.bf16.mxu1 %v2807_v1  ;;  %2584 = vmatprep.subr.bf16.mxu0 %v2807_v1 }
 0x11d   :  { %2561 = vmatmul.mubr.msk.bf16.vlgmr.msra.gmra.mrb[20].mxu0 %vm2138_vm7, %v2809_v48 }
 0x11e   :  { %2579 = vmatpush3.bf16.msra.mxu1 %v2770_v14  ;;  %2585 = vmatpush3.bf16.msra.mxu0 %v2771_v15 }
 0x11f   :  { %2586 = vmatprep.subr.bf16.mxu0 %v2807_v1  ;;  %2604 = vmatprep.subr.bf16.mxu1 %v2807_v1 }
 0x120   :  { %2600 = vmatprep.mubr.msk.bf16.mxu0 %vm2808_vm0, %v2807_v1 }
 0x121   :  { %2581 = vmatmul.mubr.msk.bf16.vlgmr.msra.gmra.mrb[20].mxu1 %vm2148_vm9, %v2809_v48 }
 0x122   :  { %2587 = vmatpush3.bf16.msra.mxu0 %v2772_v16  ;;  %2605 = vmatpush3.bf16.msra.mxu1 %v2773_v17 }
 0x123   :  { %2588 = vmatprep.subr.bf16.mxu0 %v2807_v1  ;;  %2606 = vmatprep.subr.bf16.mxu1 %v2807_v1 }
 0x124   :  { %2620 = vmatprep.mubr.msk.bf16.mxu1 %vm2808_vm0, %v2807_v1 }
 0x126   :  { %2589 = vmatpush3.bf16.msra.mxu0 %v2774_v18  ;;  %2607 = vmatpush3.bf16.msra.mxu1 %v2775_v19 }
 0x127   :  { %2590 = vmatprep.subr.bf16.mxu0 %v2807_v1  ;;  %2608 = vmatprep.subr.bf16.mxu1 %v2807_v1 }
 0x12a   :  { %2591 = vmatpush3.bf16.msra.mxu0 %v2776_v20  ;;  %2609 = vmatpush3.bf16.msra.mxu1 %v2777_v21 }
 0x12b   :  { %2592 = vmatprep.subr.bf16.mxu0 %v2807_v1  ;;  %2610 = vmatprep.subr.bf16.mxu1 %v2807_v1 }
 0x12e   :  { %2593 = vmatpush3.bf16.msra.mxu0 %v2778_v22  ;;  %2611 = vmatpush3.bf16.msra.mxu1 %v2779_v23 }
 0x12f   :  { %2594 = vmatprep.subr.bf16.mxu0 %v2807_v1  ;;  %2612 = vmatprep.subr.bf16.mxu1 %v2807_v1 }
 0x132   :  { %2595 = vmatpush3.bf16.msra.mxu0 %v2780_v24  ;;  %2613 = vmatpush3.bf16.msra.mxu1 %v2781_v25 }
 0x133   :  { %2596 = vmatprep.subr.bf16.mxu0 %v2807_v1  ;;  %2614 = vmatprep.subr.bf16.mxu1 %v2807_v1 }
 0x136   :  { %2597 = vmatpush3.bf16.msra.mxu0 %v2782_v26  ;;  %2615 = vmatpush3.bf16.msra.mxu1 %v2783_v27 }
 0x137   :  { %2598 = vmatprep.subr.bf16.mxu0 %v2807_v1  ;;  %2616 = vmatprep.subr.bf16.mxu1 %v2807_v1 }
 0x13a   :  { %2599 = vmatpush3.bf16.msra.mxu0 %v2784_v29  ;;  %2617 = vmatpush3.bf16.msra.mxu1 %v2785_v30 }
 0x13b   :  { %2618 = vmatprep.subr.bf16.mxu1 %v2807_v1  ;;  %2624 = vmatprep.subr.bf16.mxu0 %v2807_v1 }
 0x13d   :  { %2601 = vmatmul.mubr.msk.bf16.vlgmr.msra.gmra.mrb[24].mxu0 %vm2158_vm11, %v2809_v48 }
 0x13e   :  { %2619 = vmatpush3.bf16.msra.mxu1 %v2786_v32  ;;  %2625 = vmatpush3.bf16.msra.mxu0 %v2787_v33 }
 0x13f   :  { %2626 = vmatprep.subr.bf16.mxu0 %v2807_v1  ;;  %2644 = vmatprep.subr.bf16.mxu1 %v2807_v1 }
 0x140   :  { %2640 = vmatprep.mubr.msk.bf16.mxu0 %vm2808_vm0, %v2807_v1 }
 0x141   :  { %2621 = vmatmul.mubr.msk.bf16.vlgmr.msra.gmra.mrb[24].mxu1 %vm2168_vm13, %v2809_v48 }
 0x142   :  { %2627 = vmatpush3.bf16.msra.mxu0 %v2788_v34  ;;  %2645 = vmatpush3.bf16.msra.mxu1 %v2789_v35 }
 0x143   :  { %2628 = vmatprep.subr.bf16.mxu0 %v2807_v1  ;;  %2646 = vmatprep.subr.bf16.mxu1 %v2807_v1 }
 0x144   :  { %2660 = vmatprep.mubr.msk.bf16.mxu1 %vm2808_vm0, %v2807_v1 }
 0x146   :  { %2629 = vmatpush3.bf16.msra.mxu0 %v2790_v36  ;;  %2647 = vmatpush3.bf16.msra.mxu1 %v2791_v37 }
 0x147   :  { %2630 = vmatprep.subr.bf16.mxu0 %v2807_v1  ;;  %2648 = vmatprep.subr.bf16.mxu1 %v2807_v1 }
 0x14a   :  { %2631 = vmatpush3.bf16.msra.mxu0 %v2792_v38  ;;  %2649 = vmatpush3.bf16.msra.mxu1 %v2793_v39 }
 0x14b   :  { %2632 = vmatprep.subr.bf16.mxu0 %v2807_v1  ;;  %2650 = vmatprep.subr.bf16.mxu1 %v2807_v1 }
 0x14e   :  { %2633 = vmatpush3.bf16.msra.mxu0 %v2794_v40  ;;  %2651 = vmatpush3.bf16.msra.mxu1 %v2795_v41 }
 0x14f   :  { %2634 = vmatprep.subr.bf16.mxu0 %v2807_v1  ;;  %2652 = vmatprep.subr.bf16.mxu1 %v2807_v1 }
 0x150   :  { %v545_v44 = vpop.f32.mrb[0].mxu0 }
 0x151   :  { %v2362_v46 = vpop.f32.mrb[1].mxu0  ;;  %v1872_v54 = vsel %vm1871_vm14, %v545_v44, 0.0 }
 0x152   :  { %2635 = vmatpush3.bf16.msra.mxu0 %v2796_v42  ;;  %2653 = vmatpush3.bf16.msra.mxu1 %v2797_v43  ;;  %v548_v47 = vpop.f32.mrb[2].mxu0 }
 0x153   :  { %v2363_v51 = vpop.f32.mrb[3].mxu0  ;;  %2636 = vmatprep.subr.bf16.mxu0 %v2807_v1  ;;  %2654 = vmatprep.subr.bf16.mxu1 %v2807_v1 }
 0x154   :  { %v633_v52 = vpop.f32.mrb[0].mxu1 }
 0x155   :  { %v1873_v55 = vsel %vm1871_vm14, %v633_v52, 0.0  ;;  %v2382_v56 = vpop.f32.mrb[1].mxu1 }
 0x156   :  { %v1874_v57 = vadd.f32 %v1873_v55, %v1872_v54  ;;  %2637 = vmatpush3.bf16.msra.mxu0 %v2798_v49  ;;  %2655 = vmatpush3.bf16.msra.mxu1 %v2799_v50  ;;  %v636_v58 = vpop.f32.mrb[2].mxu1 }
 0x157   :  { %v2383_v61 = vpop.f32.mrb[3].mxu1  ;;  %2638 = vmatprep.subr.bf16.mxu0 %v2807_v1  ;;  %2656 = vmatprep.subr.bf16.mxu1 %v2807_v1 }
 0x15a   :  { %2639 = vmatpush3.bf16.msra.mxu0 %v2800_v59  ;;  %2657 = vmatpush3.bf16.msra.mxu1 %v2801_v60 }
 0x15b   :  { %2658 = vmatprep.subr.bf16.mxu1 %v2807_v1  ;;  %2664 = vmatprep.subr.bf16.mxu0 %v2807_v1 }
 0x15d   :  { %2641 = vmatmul.mubr.msk.bf16.vlgmr.msra.gmra.mrb[28].mxu0 %vm2178_vm1, %v2809_v48 }
 0x15e   :  { %2659 = vmatpush3.bf16.msra.mxu1 %v2802_v63  ;;  %2668 = vmatprep.mubr.msk.bf16.mxu0 %vm2808_vm0, %v2807_v1 }
 0x161   :  { %2661 = vmatmul.mubr.msk.bf16.vlgmr.msra.gmra.mrb[28].mxu1 %vm2188_vm3, %v2809_v48 }
 0x170   :  { %v721_v0 = vpop.f32.mrb[4].mxu0 }
 0x171   :  { %v1875_v2 = vsel %vm1871_vm14, %v721_v0, 0.0  ;;  %v2402_v3 = vpop.f32.mrb[5].mxu0 }
 0x172   :  { %v1876_v4 = vadd.f32 %v1875_v2, %v1874_v57  ;;  %v724_v5 = vpop.f32.mrb[6].mxu0 }
 0x173   :  { %v2403_v6 = vpop.f32.mrb[7].mxu0 }
 0x174   :  { %v809_v7 = vpop.f32.mrb[4].mxu1 }
 0x175   :  { %v1877_v45 = vsel %vm1871_vm14, %v809_v7, 0.0  ;;  %v2422_v8 = vpop.f32.mrb[5].mxu1 }
 0x176   :  { %v1878_v9 = vadd.f32 %v1877_v45, %v1876_v4  ;;  %v812_v10 = vpop.f32.mrb[6].mxu1 }
 0x177   :  { %v2423_v11 = vpop.f32.mrb[7].mxu1 }
 0x190   :  { %v897_v12 = vpop.f32.mrb[8].mxu0 }
 0x191   :  { %v1879_v13 = vsel %vm1871_vm14, %v897_v12, 0.0  ;;  %v2442_v14 = vpop.f32.mrb[9].mxu0 }
 0x192   :  { %v1880_v15 = vadd.f32 %v1879_v13, %v1878_v9  ;;  %v900_v48 = vpop.f32.mrb[10].mxu0 }
 0x193   :  { %v2443_v16 = vpop.f32.mrb[11].mxu0 }
 0x194   :  { %v985_v17 = vpop.f32.mrb[8].mxu1 }
 0x195   :  { %v1881_v18 = vsel %vm1871_vm14, %v985_v17, 0.0  ;;  %v2462_v19 = vpop.f32.mrb[9].mxu1  ;;  %v2190_v17 = vld [vmem:[%s3508_s2] ss:$0 sm:$0xff] }
 0x196   :  { %v1882_v20 = vadd.f32 %v1881_v18, %v1880_v15  ;;  %v988_v21 = vpop.f32.mrb[10].mxu1 }
 0x197   :  { %v2463_v22 = vpop.f32.mrb[11].mxu1 }
 0x1b0   :  { %v1073_v23 = vpop.f32.mrb[12].mxu0 }
 0x1b1   :  { %v1883_v24 = vsel %vm1871_vm14, %v1073_v23, 0.0  ;;  %v2482_v25 = vpop.f32.mrb[13].mxu0 }
 0x1b2   :  { %v1884_v26 = vadd.f32 %v1883_v24, %v1882_v20  ;;  %v1076_v27 = vpop.f32.mrb[14].mxu0 }
 0x1b3   :  { %v2483_v28 = vpop.f32.mrb[15].mxu0 }
 0x1b4   :  { %v1161_v29 = vpop.f32.mrb[12].mxu1  ;;  %v2803_v28 = vld [vmem:[%s3509_s5] sm:$0xff]  }
 0x1b5   :  { %v1885_v30 = vsel %vm1871_vm14, %v1161_v29, 0.0  ;;  %v2502_v31 = vpop.f32.mrb[13].mxu1  ;;  %2665 = vmatpush3.bf16.msra.mxu0 %v2803_v28  ;;  %v2804_v29 = vld [vmem:[%s3509_s5 + $0x8] sm:$0xff]  }
 0x1b6   :  { %v1886_v32 = vadd.f32 %v1885_v30, %v1884_v26  ;;  %v1164_v33 = vpop.f32.mrb[14].mxu1  ;;  %2666 = vmatprep.subr.bf16.mxu0 %v2807_v1  ;;  %v2193_v1 = vld [vmem:[%s3512_s6] ss:$0 sm:$0xff] }
 0x1b7   :  { %v2503_v34 = vpop.f32.mrb[15].mxu1 }
 0x1b8   :  { %v2191_v34 = vld [vmem:[%s3510_s3] ss:$0 sm:$0xff] }
 0x1b9   :  { %2667 = vmatpush3.bf16.msra.mxu0 %v2804_v29 }
 0x1d0   :  { %v1249_v35 = vpop.f32.mrb[16].mxu0 }
 0x1d1   :  { %v1887_v36 = vsel %vm1871_vm14, %v1249_v35, 0.0  ;;  %v2522_v37 = vpop.f32.mrb[17].mxu0 }
 0x1d2   :  { %v1888_v38 = vadd.f32 %v1887_v36, %v1886_v32  ;;  %v1252_v39 = vpop.f32.mrb[18].mxu0  ;;  %v2192_v36 = vld [vmem:[%s3511_s4] ss:$0 sm:$0xff] }
 0x1d3   :  { %v2523_v40 = vpop.f32.mrb[19].mxu0 }
 0x1d4   :  { %v1337_v41 = vpop.f32.mrb[16].mxu1 }
 0x1d5   :  { %v1889_v42 = vsel %vm1871_vm14, %v1337_v41, 0.0  ;;  %v2542_v43 = vpop.f32.mrb[17].mxu1 }
 0x1d6   :  { %v1890_v44 = vadd.f32 %v1889_v42, %v1888_v38  ;;  %v1340_v46 = vpop.f32.mrb[18].mxu1 }
 0x1d7   :  { %v2543_v47 = vpop.f32.mrb[19].mxu1 }
 0x1f0   :  { %v1425_v49 = vpop.f32.mrb[20].mxu0 }
 0x1f1   :  { %v1891_v50 = vsel %vm1871_vm14, %v1425_v49, 0.0  ;;  %v2562_v51 = vpop.f32.mrb[21].mxu0 }
 0x1f2   :  { %v1892_v52 = vadd.f32 %v1891_v50, %v1890_v44  ;;  %v1428_v53 = vpop.f32.mrb[22].mxu0 }
 0x1f3   :  { %v2563_v54 = vpop.f32.mrb[23].mxu0 }
 0x1f4   :  { %v1513_v55 = vpop.f32.mrb[20].mxu1 }
 0x1f5   :  { %v1893_v56 = vsel %vm1871_vm14, %v1513_v55, 0.0  ;;  %v2582_v57 = vpop.f32.mrb[21].mxu1 }
 0x1f6   :  { %v1894_v58 = vadd.f32 %v1893_v56, %v1892_v52  ;;  %v1516_v59 = vpop.f32.mrb[22].mxu1 }
 0x1f7   :  { %v2583_v60 = vpop.f32.mrb[23].mxu1 }
 0x210   :  { %v1601_v61 = vpop.f32.mrb[24].mxu0 }
 0x211   :  { %v1895_v62 = vsel %vm1871_vm14, %v1601_v61, 0.0  ;;  %v2602_v63 = vpop.f32.mrb[25].mxu0 }
 0x212   :  { %v1896_v0 = vadd.f32 %v1895_v62, %v1894_v58  ;;  %v1604_v2 = vpop.f32.mrb[26].mxu0 }
 0x213   :  { %v2603_v3 = vpop.f32.mrb[27].mxu0 }
 0x214   :  { %v1689_v4 = vpop.f32.mrb[24].mxu1 }
 0x215   :  { %v1897_v5 = vsel %vm1871_vm14, %v1689_v4, 0.0  ;;  %v2622_v6 = vpop.f32.mrb[25].mxu1 }
 0x216   :  { %v1898_v7 = vadd.f32 %v1897_v5, %v1896_v0  ;;  %v1692_v45 = vpop.f32.mrb[26].mxu1 }
 0x217   :  { %v2623_v8 = vpop.f32.mrb[27].mxu1 }
 0x230   :  { %v1777_v9 = vpop.f32.mrb[28].mxu0 }
 0x231   :  { %v1899_v10 = vsel %vm1871_vm14, %v1777_v9, 0.0  ;;  %v2642_v11 = vpop.f32.mrb[29].mxu0 }
 0x232   :  { %v1900_v12 = vadd.f32 %v1899_v10, %v1898_v7  ;;  %v1780_v13 = vpop.f32.mrb[30].mxu0 }
 0x233   :  { %v2643_v14 = vpop.f32.mrb[31].mxu0 }
 0x234   :  { %v1865_v15 = vpop.f32.mrb[28].mxu1 }
 0x235   :  { %v1901_v48 = vsel %vm1871_vm14, %v1865_v15, 0.0  ;;  %v2662_v16 = vpop.f32.mrb[29].mxu1 }
 0x236   :  { %v1902_v18 = vadd.f32 %v1901_v48, %v1900_v12  ;;  %v1868_v19 = vpop.f32.mrb[30].mxu1 }
 0x237   :  { %v2663_v20 = vpop.f32.mrb[31].mxu1 }
 0x238   :  { %v1910_v21 = vadd.f32 %v2190_v17, %v1902_v18 }
 0x23a   :  { %v1911_v22 = vsel %vm1871_vm14, %v1910_v21, 0.0 }
 0x23b   :  { %1912 = vadd.xlane.f32.xlu0 %v1911_v22 }
 0x2c8   :  { %v1913_v23 = vpop.xlane.xlu0 %1912 }
 0x2c9   :  { %v1915_v24 = vmul.f32 0.03125, %v1913_v23 }
 0x2cb   :  { %v1916_v25 = vsub.f32 %v1910_v21, %v1915_v24 }
 0x2cd   :  { %v1917_v26 = vmul.f32 %v1916_v25, %v1916_v25 }
 0x2cf   :  { %v1918_v27 = vsel %vm1871_vm14, %v1917_v26, 0.0 }
 0x2d0   :  { %1919 = vadd.xlane.f32.xlu1 %v1918_v27 }
 0x35d   :  { %v1920_v30 = vpop.xlane.xlu1 %1919 }
 0x35e   :  { %v1921_v31 = vmul.f32 0.03125, %v1920_v30 }
 0x360   :  { %v1922_v32 = vadd.f32 1e-05, %v1921_v31 }
 0x362   :  { %2805 = vrsqrt.f32 %v1922_v32 }
 0x36c   :  { %v2806_v33 = vpop.eup %2805 }
 0x36d   :  { %v1924_v35 = vmul.f32 %v2806_v33, %v1916_v25 }
 0x36f   :  { %v1932_v37 = vmul.f32 %v2191_v34, %v1924_v35 }
 0x371   :  { %v1940_v38 = vadd.f32 %v2192_v36, %v1932_v37 }
 0x373   :  { %v1941_v39 = vmax.f32 %v1940_v38, 0.0 }
 0x375   :  { %v1942_v40 = vpack.c.bf16 %v1941_v39, %v1941_v39 }
 0x377   :  { %2669 = vmatmul.mubr.msk.bf16.vlgmr.msra.gmra.mrb[32].mxu0 %vm1871_vm14, %v1942_v40 }
 0x44a   :  { %v2003_v41 = vpop.f32.mrb[32].mxu0 }
 0x44b   :  { %v2004_v42 = vadd.f32 %v2193_v1, %v2003_v41  ;;  %v2670_v43 = vpop.f32.mrb[33].mxu0 }
 0x44c   :  { %v2006_v44 = vpop.f32.mrb[34].mxu0 }
 0x44d   :  { %2009 = vst [vmem:[%s3513_s7] sm:$0xff] %v2004_v42  ;;  %v2671_v46 = vpop.f32.mrb[35].mxu0 }

</bundles_post_ra>
